<compile_context>
chip_gen: v7x
topology: tpu7x:2x2x1
jax: 0.10.0
libtpu: 0.0.40
codegen_flags: <defaults>
</compile_context>

<pallas_src>
import functools

import numpy as np
import jax
import jax.numpy as jnp
from jax.experimental import pallas as pl
from jax.experimental.pallas import tpu as pltpu

ACT_DTYPE = jnp.bfloat16   # activation / MXU dtype (accumulation stays f32)
HALO_ROWS = 16             # halo strip height; multiple of 16 keeps blocks (8,128)-aligned


def _round_up(x, m):
    return (x + m - 1) // m * m


def _choose_tile_rows(wa, cin, cout, oh, esz, stack):
    """Output rows computed per grid step (multiple of 16)."""
    # Rough VMEM bytes per output row: double-buffered input strip, VMEM patch
    # matrix ("stack" shifted copies), f32 matmul result, double-buffered output.
    per_row = wa * (cin * esz * (2 + stack) + cout * (2 * esz + 4))
    budget = 10 * 1024 * 1024                      # comfortably inside v5e/v6e/v7x limits
    th = max(16, min(64, (budget // max(per_row, 1)) // 16 * 16))
    if oh > 16:                                    # prefer >= 2 grid steps (v7x megacore)
        th = min(th, 16 * ((oh + 31) // 32))
    th = min(th, 16 * ((oh + 15) // 16))
    return th


def _prep_input(x_nchw, pad, hpad, wa):
    """Zero-pad (N,C,H,W) into an (N, C, hpad*wa) flattened frame (`pad` on top/left)."""
    n, c, h, w = x_nchw.shape
    xp = jnp.pad(x_nchw, ((0, 0), (0, 0), (pad, hpad - h - pad), (pad, wa - w - pad)))
    return xp.reshape(n, c, hpad * wa)


# ----------------------------- Pallas kernels -------------------------------

def _conv_strip_kernel(xa_ref, xb_ref, w_ref, b_ref, o_ref, xs_ref,
                       *, cin, kh, kw, wa, m):
    """Fused im2col + MXU matmul + bias + ReLU for one row-strip of the output.

    xa_ref: (1, cin, m)             main input strip (flat pixels on lanes, pitch wa)
    xb_ref: (1, cin, HALO_ROWS*wa)  halo rows just below the strip
    w_ref : (cout, kh*kw*cin)       reshaped conv weights
    b_ref : (cout, 1)               bias (f32)
    o_ref : (1, cout, m)            output strip
    xs_ref: (kh*kw*cin, m)          VMEM patch-matrix scratch
    """
    for t in range(kh * kw):
        r, q = divmod(t, kw)
        off = r * wa + q                       # flat shift of this tap
        lo = t * cin
        xs_ref[lo:lo + cin, 0:m - off] = xa_ref[0, :, off:m]
        if off > 0:
            xs_ref[lo:lo + cin, m - off:m] = xb_ref[0, :, 0:off]
    acc = jnp.dot(w_ref[...], xs_ref[...], preferred_element_type=jnp.float32)
    o_ref[0] = jnp.maximum(acc + b_ref[...], 0.0).astype(o_ref.dtype)


def _pool_strip_kernel(xa_ref, xb_ref, o_ref, xs_ref, *, wa, m):
    """MaxPool2d(kernel=[2,2], stride=1) on one row-strip: max of 4 flat shifts."""
    xs_ref[:, 0:m] = xa_ref[0]
    xs_ref[:, m:] = xb_ref[0]
    o_ref[0] = jnp.maximum(
        jnp.maximum(xs_ref[:, 0:m], xs_ref[:, 1:m + 1]),
        jnp.maximum(xs_ref[:, wa:wa + m], xs_ref[:, wa + 1:wa + 1 + m]))


# ------------------------------ op wrappers ----------------------------------

def _strip_conv_call(x_nchw, taps_w, bias, kh, kw, pad):
    """Run the fused conv kernel (always logically stride-1, kernel kh x kw)."""
    n, cin, h, w = x_nchw.shape
    cout = taps_w.shape[0]
    hp, wp = h + 2 * pad, w + 2 * pad
    oh, ow = hp - kh + 1, wp - kw + 1
    wa = _round_up(wp, 8)
    esz = jnp.dtype(ACT_DTYPE).itemsize
    th = _choose_tile_rows(wa, cin, cout, oh, esz, kh * kw)
    t_steps = pl.cdiv(oh, th)
    hpad = t_steps * th + HALO_ROWS
    m = th * wa
    x_flat = _prep_input(x_nchw, pad, hpad, wa)

    kernel = functools.partial(_conv_strip_kernel, cin=cin, kh=kh, kw=kw, wa=wa, m=m)
    y = pl.pallas_call(
        kernel,
        out_shape=jax.ShapeDtypeStruct((n, cout, t_steps * m), ACT_DTYPE),
        grid=(n, t_steps),
        in_specs=[
            pl.BlockSpec((1, cin, m), lambda b, t: (b, 0, t)),
            pl.BlockSpec((1, cin, HALO_ROWS * wa),
                         lambda b, t: (b, 0, (t + 1) * (th // HALO_ROWS))),
            pl.BlockSpec((cout, kh * kw * cin), lambda b, t: (0, 0)),
            pl.BlockSpec((cout, 1), lambda b, t: (0, 0)),
        ],
        out_specs=pl.BlockSpec((1, cout, m), lambda b, t: (b, 0, t)),
        scratch_shapes=[pltpu.VMEM((kh * kw * cin, m), ACT_DTYPE)],
        compiler_params=pltpu.CompilerParams(
            dimension_semantics=("parallel", "parallel"),
            vmem_limit_bytes=32 * 1024 * 1024),
    )(x_flat, x_flat, taps_w, bias)

    return y.reshape(n, cout, t_steps * th, wa)[:, :, :oh, :ow]


def conv2d_relu(x_nchw, w_oihw, b, stride, pad):
    """PyTorch-semantics 3x3 Conv2d (stride 1|2, zero padding) + fused ReLU."""
    assert stride in (1, 2)
    x = x_nchw.astype(ACT_DTYPE)
    cout, cin = w_oihw.shape[0], w_oihw.shape[1]
    bias = b.reshape(cout, 1).astype(jnp.float32)

    if stride == 1:
        taps_w = jnp.transpose(w_oihw, (0, 2, 3, 1)).reshape(cout, 9 * cin)
        return _strip_conv_call(x, taps_w.astype(ACT_DTYPE), bias, 3, 3, pad)

    # stride 2: fold into a stride-1 2x2 conv over a space-to-depth input, so the
    # kernel never needs strided slicing.
    n, _, h, w = x.shape
    hp, wp = _round_up(h + 2 * pad, 2), _round_up(w + 2 * pad, 2)
    xp = jnp.pad(x, ((0, 0), (0, 0), (pad, hp - h - pad), (pad, wp - w - pad)))
    xp = xp.reshape(n, cin, hp // 2, 2, wp // 2, 2)
    x2 = jnp.transpose(xp, (0, 3, 5, 1, 2, 4)).reshape(n, 4 * cin, hp // 2, wp // 2)

    w4 = jnp.zeros((2, 2, cout, 2, 2, cin), w_oihw.dtype)
    for i in range(3):
        for j in range(3):
            w4 = w4.at[i // 2, j // 2, :, i % 2, j % 2, :].set(w_oihw[:, :, i, j])
    taps_w = jnp.transpose(w4, (2, 0, 1, 3, 4, 5)).reshape(cout, 4 * 4 * cin)
    return _strip_conv_call(x2, taps_w.astype(ACT_DTYPE), bias, 2, 2, 0)


def maxpool_2x2_s1(x_nchw):
    """nn.MaxPool2d(kernel_size=[2, 2], stride=1) as a single-input halo kernel."""
    x = x_nchw.astype(ACT_DTYPE)
    n, c, h, w = x.shape
    oh, ow = h - 1, w - 1
    wa = _round_up(w, 8)
    esz = jnp.dtype(ACT_DTYPE).itemsize
    th = _choose_tile_rows(wa, c, c, oh, esz, 1)
    t_steps = pl.cdiv(oh, th)
    hpad = t_steps * th + HALO_ROWS
    m = th * wa
    x_flat = _prep_input(x, 0, hpad, wa)

    kernel = functools.partial(_pool_strip_kernel, wa=wa, m=m)
    y = pl.pallas_call(
        kernel,
        out_shape=jax.ShapeDtypeStruct((n, c, t_steps * m), ACT_DTYPE),
        grid=(n, t_steps),
        in_specs=[
            pl.BlockSpec((1, c, m), lambda b, t: (b, 0, t)),
            pl.BlockSpec((1, c, HALO_ROWS * wa),
                         lambda b, t: (b, 0, (t + 1) * (th // HALO_ROWS))),
        ],
        out_specs=pl.BlockSpec((1, c, m), lambda b, t: (b, 0, t)),
        scratch_shapes=[pltpu.VMEM((c, m + HALO_ROWS * wa), ACT_DTYPE)],
        compiler_params=pltpu.CompilerParams(
            dimension_semantics=("parallel", "parallel"),
            vmem_limit_bytes=32 * 1024 * 1024),
    )(x_flat, x_flat)

    return y.reshape(n, c, t_steps * th, wa)[:, :, :oh, :ow]


# ------------------------------ model definition ------------------------------

# Each entry: ("conv", cin, cout, stride, pad) | ("pool",)
# Every conv in the PyTorch model is followed by nn.ReLU -> fused into the kernel.
# The leading nn.ReLU of modules 2-6 is a no-op after the fused ReLU and is dropped.
MODULE_DEFS = [
    [("conv", 3, 16, 1, 1), ("pool",), ("conv", 16, 16, 1, 1), ("conv", 16, 16, 1, 1),
     ("conv", 16, 32, 2, 1), ("conv", 32, 32, 1, 1), ("conv", 32, 64, 1, 1),
     ("conv", 64, 64, 2, 1), ("conv", 64, 64, 1, 1), ("conv", 64, 64, 1, 1),
     ("conv", 64, 128, 1, 1), ("conv", 128, 128, 2, 1)],
    [("conv", 128, 128, 1, 1), ("conv", 128, 256, 2, 1)],
    [("conv", 256, 256, 1, 1), ("conv", 256, 256, 2, 1)],
    [("conv", 256, 128, 1, 1), ("conv", 128, 128, 2, 1)],
    [("conv", 128, 128, 1, 1), ("conv", 128, 64, 2, 1)],
    [("conv", 64, 128, 1, 1), ("conv", 128, 64, 1, 0)],
]

OUT_CHANNELS = [128, 256, 256, 128, 64, 64]
OUT_FEATURE_SIZES = [(38, 38), (19, 19), (10, 10), (5, 5), (3, 3), (1, 1)]


def init_params(key):
    """Deterministic PyTorch-like (kaiming-uniform-ish) init for every conv."""
    params = []
    for module in MODULE_DEFS:
        for layer in module:
            if layer[0] != "conv":
                continue
            _, cin, cout, _, _ = layer
            key, kw_key, kb_key = jax.random.split(key, 3)
            fan_in = cin * 3 * 3
            bound = 1.0 / np.sqrt(fan_in)
            w = jax.random.uniform(kw_key, (cout, cin, 3, 3), jnp.float32, -bound, bound)
            b = jax.random.uniform(kb_key, (cout,), jnp.float32, -bound, bound)
            params.append((w, b))
    return params


def forward(x_nchw, params):
    """Returns tuple of 6 feature maps in NCHW (float32), matching BasicModel.forward."""
    x = x_nchw
    out_features = []
    p_idx = 0
    for module in MODULE_DEFS:
        for layer in module:
            if layer[0] == "conv":
                _, _, _, stride, pad = layer
                w, b = params[p_idx]
                p_idx += 1
                x = conv2d_relu(x, w, b, stride, pad)   # ReLU fused in the kernel
            elif layer[0] == "pool":
                x = maxpool_2x2_s1(x)
        out_features.append(x.astype(jnp.float32))
    return tuple(out_features)


# ------------------------------- self checks ---------------------------------

def _reference_conv_relu(x, w, b, stride, pad):
    y = jax.lax.conv_general_dilated(
        x, w, window_strides=(stride, stride),
        padding=[(pad, pad), (pad, pad)],
        dimension_numbers=("NCHW", "OIHW", "NCHW"))
    return jnp.maximum(y + b.reshape(1, -1, 1, 1), 0.0)


def _self_test():
    key = jax.random.PRNGKey(0)
    kx, kw_key, kb_key = jax.random.split(key, 3)
    x = jax.random.normal(kx, (2, 4, 13, 11), jnp.float32)
    w = jax.random.uniform(kw_key, (6, 4, 3, 3), jnp.float32, -0.5, 0.5)
    b = jax.random.uniform(kb_key, (6,), jnp.float32, -0.5, 0.5)
    for stride, pad in ((1, 1), (2, 1), (1, 0)):
        got = np.array(conv2d_relu(x, w, b, stride, pad).astype(jnp.float32))
        want = np.array(_reference_conv_relu(x, w, b, stride, pad))
        assert got.shape == want.shape, (got.shape, want.shape)
        err = np.abs(got - want).max()
        assert np.allclose(got, want, atol=0.1, rtol=0.1), \
            f"conv mismatch stride={stride} pad={pad} max_err={err}"
    got = np.array(maxpool_2x2_s1(x).astype(jnp.float32))
    want = np.array(jnp.maximum(jnp.maximum(x[:, :, :-1, :-1], x[:, :, :-1, 1:]),
                                jnp.maximum(x[:, :, 1:, :-1], x[:, :, 1:, 1:])))
    assert np.allclose(got, want, atol=0.1, rtol=0.1), "maxpool mismatch"


if __name__ == "__main__":
    # The architecture (pool + stride-2 convs, then a final padding-0 3x3 conv)
    # requires the canonical SSD300 input to produce its self-asserted feature
    # pyramid (38,19,10,5,3,1); batch kept at 1 to stay small.
    _self_test()

    key = jax.random.PRNGKey(0)
    k_params, k_x = jax.random.split(key)
    params = init_params(k_params)
    x = jax.random.normal(k_x, (1, 3, 300, 300), jnp.float32)

    fwd = jax.jit(forward)
    feats = fwd(x, params)
    feats = jax.block_until_ready(feats)

    assert len(feats) == len(OUT_FEATURE_SIZES)
    for idx, feature in enumerate(feats):
        oc = OUT_CHANNELS[idx]
        h, w = OUT_FEATURE_SIZES[idx]
        expected = (oc, h, w)
        got = tuple(feature.shape[1:])
        assert got == expected, f"Expected shape: {expected}, got: {got} at output IDX: {idx}"
        assert feature.dtype == jnp.float32
        assert bool(jnp.all(feature >= 0.0))   # every module ends in (fused) ReLU

    print("KERNEL_OK")
</pallas_src>

<mosaic_0001>
module attributes {stable_mosaic.version = 11 : i64} {
  func.func @_conv_strip_kernel(%arg0: i32, %arg1: i32, %arg2: memref<1x4x256xbf16, #tpu.memory_space<vmem>>, %arg3: memref<1x4x256xbf16, #tpu.memory_space<vmem>>, %arg4: memref<6x36xbf16, #tpu.memory_space<vmem>>, %arg5: memref<6x1xf32, #tpu.memory_space<vmem>>, %arg6: memref<1x6x256xbf16, #tpu.memory_space<vmem>>, %arg7: memref<36x256xbf16, #tpu.memory_space<vmem>>) attributes {dimension_semantics = [#tpu.dimension_semantics<parallel>, #tpu.dimension_semantics<parallel>], iteration_bounds = array<i64: 2, 1>, scalar_prefetch = 0 : i64, scratch_operands = 1 : i64, tpu.core_type = #tpu.core_type<tc>, window_params = [{transform_indices = @transform_0, window_bounds = array<i64: 1, 4, 256>}, {transform_indices = @transform_1, window_bounds = array<i64: 1, 4, 256>}, {pipeline_mode = #tpu.pipeline_mode<synchronous>, transform_indices = @transform_2, window_bounds = array<i64: 6, 36>}, {pipeline_mode = #tpu.pipeline_mode<synchronous>, transform_indices = @transform_3, window_bounds = array<i64: 6, 1>}, {transform_indices = @transform_4, window_bounds = array<i64: 1, 6, 256>}]} {
    %c0 = arith.constant 0 : index
    %c0_0 = arith.constant 0 : index
    %c0_1 = arith.constant 0 : index
    %0 = vector.load %arg2[%c0, %c0_0, %c0_1] : memref<1x4x256xbf16, #tpu.memory_space<vmem>>, vector<1x4x256xbf16>
    %1 = vector.shape_cast %0 : vector<1x4x256xbf16> to vector<4x256xbf16>
    %c0_2 = arith.constant 0 : index
    %c0_3 = arith.constant 0 : index
    %2 = vector.load %arg7[%c0_2, %c0_3] : memref<36x256xbf16, #tpu.memory_space<vmem>>, vector<4x256xbf16>
    tpu.vector_store %arg7[%c0_2, %c0_3], %1 {strides = array<i32>} : memref<36x256xbf16, #tpu.memory_space<vmem>>, vector<4x256xbf16>,
    %c0_4 = arith.constant 0 : index
    %c0_5 = arith.constant 0 : index
    %c1 = arith.constant 1 : index
    %3 = vector.load %arg2[%c0_4, %c0_5, %c1] : memref<1x4x256xbf16, #tpu.memory_space<vmem>>, vector<1x4x255xbf16>
    %4 = vector.shape_cast %3 : vector<1x4x255xbf16> to vector<4x255xbf16>
    %c4 = arith.constant 4 : index
    %c0_6 = arith.constant 0 : index
    %5 = vector.load %arg7[%c4, %c0_6] : memref<36x256xbf16, #tpu.memory_space<vmem>>, vector<4x255xbf16>
    tpu.vector_store %arg7[%c4, %c0_6], %4 {strides = array<i32>} : memref<36x256xbf16, #tpu.memory_space<vmem>>, vector<4x255xbf16>,
    %c0_7 = arith.constant 0 : index
    %c0_8 = arith.constant 0 : index
    %c0_9 = arith.constant 0 : index
    %6 = vector.load %arg3[%c0_7, %c0_8, %c0_9] : memref<1x4x256xbf16, #tpu.memory_space<vmem>>, vector<1x4x1xbf16>
    %7 = vector.shape_cast %6 : vector<1x4x1xbf16> to vector<4x1xbf16>
    %c4_10 = arith.constant 4 : index
    %c255 = arith.constant 255 : index
    %8 = vector.load %arg7[%c4_10, %c255] : memref<36x256xbf16, #tpu.memory_space<vmem>>, vector<4x1xbf16>
    tpu.vector_store %arg7[%c4_10, %c255], %7 {strides = array<i32>} : memref<36x256xbf16, #tpu.memory_space<vmem>>, vector<4x1xbf16>,
    %c0_11 = arith.constant 0 : index
    %c0_12 = arith.constant 0 : index
    %c2 = arith.constant 2 : index
    %9 = vector.load %arg2[%c0_11, %c0_12, %c2] : memref<1x4x256xbf16, #tpu.memory_space<vmem>>, vector<1x4x254xbf16>
    %10 = vector.shape_cast %9 : vector<1x4x254xbf16> to vector<4x254xbf16>
    %c8 = arith.constant 8 : index
    %c0_13 = arith.constant 0 : index
    %11 = vector.load %arg7[%c8, %c0_13] : memref<36x256xbf16, #tpu.memory_space<vmem>>, vector<4x254xbf16>
    tpu.vector_store %arg7[%c8, %c0_13], %10 {strides = array<i32>} : memref<36x256xbf16, #tpu.memory_space<vmem>>, vector<4x254xbf16>,
    %c0_14 = arith.constant 0 : index
    %c0_15 = arith.constant 0 : index
    %c0_16 = arith.constant 0 : index
    %12 = vector.load %arg3[%c0_14, %c0_15, %c0_16] : memref<1x4x256xbf16, #tpu.memory_space<vmem>>, vector<1x4x2xbf16>
    %13 = vector.shape_cast %12 : vector<1x4x2xbf16> to vector<4x2xbf16>
    %c8_17 = arith.constant 8 : index
    %c254 = arith.constant 254 : index
    %14 = vector.load %arg7[%c8_17, %c254] : memref<36x256xbf16, #tpu.memory_space<vmem>>, vector<4x2xbf16>
    tpu.vector_store %arg7[%c8_17, %c254], %13 {strides = array<i32>} : memref<36x256xbf16, #tpu.memory_space<vmem>>, vector<4x2xbf16>,
    %c0_18 = arith.constant 0 : index
    %c0_19 = arith.constant 0 : index
    %c16 = arith.constant 16 : index
    %15 = vector.load %arg2[%c0_18, %c0_19, %c16] : memref<1x4x256xbf16, #tpu.memory_space<vmem>>, vector<1x4x240xbf16>
    %16 = vector.shape_cast %15 : vector<1x4x240xbf16> to vector<4x240xbf16>
    %c12 = arith.constant 12 : index
    %c0_20 = arith.constant 0 : index
    %17 = vector.load %arg7[%c12, %c0_20] : memref<36x256xbf16, #tpu.memory_space<vmem>>, vector<4x240xbf16>
    tpu.vector_store %arg7[%c12, %c0_20], %16 {strides = array<i32>} : memref<36x256xbf16, #tpu.memory_space<vmem>>, vector<4x240xbf16>,
    %c0_21 = arith.constant 0 : index
    %c0_22 = arith.constant 0 : index
    %c0_23 = arith.constant 0 : index
    %18 = vector.load %arg3[%c0_21, %c0_22, %c0_23] : memref<1x4x256xbf16, #tpu.memory_space<vmem>>, vector<1x4x16xbf16>
    %19 = vector.shape_cast %18 : vector<1x4x16xbf16> to vector<4x16xbf16>
    %c12_24 = arith.constant 12 : index
    %c240 = arith.constant 240 : index
    %20 = vector.load %arg7[%c12_24, %c240] : memref<36x256xbf16, #tpu.memory_space<vmem>>, vector<4x16xbf16>
    tpu.vector_store %arg7[%c12_24, %c240], %19 {strides = array<i32>} : memref<36x256xbf16, #tpu.memory_space<vmem>>, vector<4x16xbf16>,
    %c0_25 = arith.constant 0 : index
    %c0_26 = arith.constant 0 : index
    %c17 = arith.constant 17 : index
    %21 = vector.load %arg2[%c0_25, %c0_26, %c17] : memref<1x4x256xbf16, #tpu.memory_space<vmem>>, vector<1x4x239xbf16>
    %22 = vector.shape_cast %21 : vector<1x4x239xbf16> to vector<4x239xbf16>
    %c16_27 = arith.constant 16 : index
    %c0_28 = arith.constant 0 : index
    %23 = vector.load %arg7[%c16_27, %c0_28] : memref<36x256xbf16, #tpu.memory_space<vmem>>, vector<4x239xbf16>
    tpu.vector_store %arg7[%c16_27, %c0_28], %22 {strides = array<i32>} : memref<36x256xbf16, #tpu.memory_space<vmem>>, vector<4x239xbf16>,
    %c0_29 = arith.constant 0 : index
    %c0_30 = arith.constant 0 : index
    %c0_31 = arith.constant 0 : index
    %24 = vector.load %arg3[%c0_29, %c0_30, %c0_31] : memref<1x4x256xbf16, #tpu.memory_space<vmem>>, vector<1x4x17xbf16>
    %25 = vector.shape_cast %24 : vector<1x4x17xbf16> to vector<4x17xbf16>
    %c16_32 = arith.constant 16 : index
    %c239 = arith.constant 239 : index
    %26 = vector.load %arg7[%c16_32, %c239] : memref<36x256xbf16, #tpu.memory_space<vmem>>, vector<4x17xbf16>
    tpu.vector_store %arg7[%c16_32, %c239], %25 {strides = array<i32>} : memref<36x256xbf16, #tpu.memory_space<vmem>>, vector<4x17xbf16>,
    %c0_33 = arith.constant 0 : index
    %c0_34 = arith.constant 0 : index
    %c18 = arith.constant 18 : index
    %27 = vector.load %arg2[%c0_33, %c0_34, %c18] : memref<1x4x256xbf16, #tpu.memory_space<vmem>>, vector<1x4x238xbf16>
    %28 = vector.shape_cast %27 : vector<1x4x238xbf16> to vector<4x238xbf16>
    %c20 = arith.constant 20 : index
    %c0_35 = arith.constant 0 : index
    %29 = vector.load %arg7[%c20, %c0_35] : memref<36x256xbf16, #tpu.memory_space<vmem>>, vector<4x238xbf16>
    tpu.vector_store %arg7[%c20, %c0_35], %28 {strides = array<i32>} : memref<36x256xbf16, #tpu.memory_space<vmem>>, vector<4x238xbf16>,
    %c0_36 = arith.constant 0 : index
    %c0_37 = arith.constant 0 : index
    %c0_38 = arith.constant 0 : index
    %30 = vector.load %arg3[%c0_36, %c0_37, %c0_38] : memref<1x4x256xbf16, #tpu.memory_space<vmem>>, vector<1x4x18xbf16>
    %31 = vector.shape_cast %30 : vector<1x4x18xbf16> to vector<4x18xbf16>
    %c20_39 = arith.constant 20 : index
    %c238 = arith.constant 238 : index
    %32 = vector.load %arg7[%c20_39, %c238] : memref<36x256xbf16, #tpu.memory_space<vmem>>, vector<4x18xbf16>
    tpu.vector_store %arg7[%c20_39, %c238], %31 {strides = array<i32>} : memref<36x256xbf16, #tpu.memory_space<vmem>>, vector<4x18xbf16>,
    %c0_40 = arith.constant 0 : index
    %c0_41 = arith.constant 0 : index
    %c32 = arith.constant 32 : index
    %33 = vector.load %arg2[%c0_40, %c0_41, %c32] : memref<1x4x256xbf16, #tpu.memory_space<vmem>>, vector<1x4x224xbf16>
    %34 = vector.shape_cast %33 : vector<1x4x224xbf16> to vector<4x224xbf16>
    %c24 = arith.constant 24 : index
    %c0_42 = arith.constant 0 : index
    %35 = vector.load %arg7[%c24, %c0_42] : memref<36x256xbf16, #tpu.memory_space<vmem>>, vector<4x224xbf16>
    tpu.vector_store %arg7[%c24, %c0_42], %34 {strides = array<i32>} : memref<36x256xbf16, #tpu.memory_space<vmem>>, vector<4x224xbf16>,
    %c0_43 = arith.constant 0 : index
    %c0_44 = arith.constant 0 : index
    %c0_45 = arith.constant 0 : index
    %36 = vector.load %arg3[%c0_43, %c0_44, %c0_45] : memref<1x4x256xbf16, #tpu.memory_space<vmem>>, vector<1x4x32xbf16>
    %37 = vector.shape_cast %36 : vector<1x4x32xbf16> to vector<4x32xbf16>
    %c24_46 = arith.constant 24 : index
    %c224 = arith.constant 224 : index
    %38 = vector.load %arg7[%c24_46, %c224] : memref<36x256xbf16, #tpu.memory_space<vmem>>, vector<4x32xbf16>
    tpu.vector_store %arg7[%c24_46, %c224], %37 {strides = array<i32>} : memref<36x256xbf16, #tpu.memory_space<vmem>>, vector<4x32xbf16>,
    %c0_47 = arith.constant 0 : index
    %c0_48 = arith.constant 0 : index
    %c33 = arith.constant 33 : index
    %39 = vector.load %arg2[%c0_47, %c0_48, %c33] : memref<1x4x256xbf16, #tpu.memory_space<vmem>>, vector<1x4x223xbf16>
    %40 = vector.shape_cast %39 : vector<1x4x223xbf16> to vector<4x223xbf16>
    %c28 = arith.constant 28 : index
    %c0_49 = arith.constant 0 : index
    %41 = vector.load %arg7[%c28, %c0_49] : memref<36x256xbf16, #tpu.memory_space<vmem>>, vector<4x223xbf16>
    tpu.vector_store %arg7[%c28, %c0_49], %40 {strides = array<i32>} : memref<36x256xbf16, #tpu.memory_space<vmem>>, vector<4x223xbf16>,
    %c0_50 = arith.constant 0 : index
    %c0_51 = arith.constant 0 : index
    %c0_52 = arith.constant 0 : index
    %42 = vector.load %arg3[%c0_50, %c0_51, %c0_52] : memref<1x4x256xbf16, #tpu.memory_space<vmem>>, vector<1x4x33xbf16>
    %43 = vector.shape_cast %42 : vector<1x4x33xbf16> to vector<4x33xbf16>
    %c28_53 = arith.constant 28 : index
    %c223 = arith.constant 223 : index
    %44 = vector.load %arg7[%c28_53, %c223] : memref<36x256xbf16, #tpu.memory_space<vmem>>, vector<4x33xbf16>
    tpu.vector_store %arg7[%c28_53, %c223], %43 {strides = array<i32>} : memref<36x256xbf16, #tpu.memory_space<vmem>>, vector<4x33xbf16>,
    %c0_54 = arith.constant 0 : index
    %c0_55 = arith.constant 0 : index
    %c34 = arith.constant 34 : index
    %45 = vector.load %arg2[%c0_54, %c0_55, %c34] : memref<1x4x256xbf16, #tpu.memory_space<vmem>>, vector<1x4x222xbf16>
    %46 = vector.shape_cast %45 : vector<1x4x222xbf16> to vector<4x222xbf16>
    %c32_56 = arith.constant 32 : index
    %c0_57 = arith.constant 0 : index
    %47 = vector.load %arg7[%c32_56, %c0_57] : memref<36x256xbf16, #tpu.memory_space<vmem>>, vector<4x222xbf16>
    tpu.vector_store %arg7[%c32_56, %c0_57], %46 {strides = array<i32>} : memref<36x256xbf16, #tpu.memory_space<vmem>>, vector<4x222xbf16>,
    %c0_58 = arith.constant 0 : index
    %c0_59 = arith.constant 0 : index
    %c0_60 = arith.constant 0 : index
    %48 = vector.load %arg3[%c0_58, %c0_59, %c0_60] : memref<1x4x256xbf16, #tpu.memory_space<vmem>>, vector<1x4x34xbf16>
    %49 = vector.shape_cast %48 : vector<1x4x34xbf16> to vector<4x34xbf16>
    %c32_61 = arith.constant 32 : index
    %c222 = arith.constant 222 : index
    %50 = vector.load %arg7[%c32_61, %c222] : memref<36x256xbf16, #tpu.memory_space<vmem>>, vector<4x34xbf16>
    tpu.vector_store %arg7[%c32_61, %c222], %49 {strides = array<i32>} : memref<36x256xbf16, #tpu.memory_space<vmem>>, vector<4x34xbf16>,
    %c0_62 = arith.constant 0 : index
    %c0_63 = arith.constant 0 : index
    %51 = vector.load %arg4[%c0_62, %c0_63] : memref<6x36xbf16, #tpu.memory_space<vmem>>, vector<6x36xbf16>
    %c0_64 = arith.constant 0 : index
    %c0_65 = arith.constant 0 : index
    %52 = vector.load %arg7[%c0_64, %c0_65] : memref<36x256xbf16, #tpu.memory_space<vmem>>, vector<36x256xbf16>
    %cst = arith.constant dense<0.000000e+00> : vector<6x256xf32>
    %53 = tpu.matmul %51, %52, %cst {dimension_numbers = #tpu.dot_dimension_numbers<[1], [0], [0], [1], [0, 0, 1, 1], [], []>} : vector<6x36xbf16>, vector<36x256xbf16>, vector<6x256xf32> -> vector<6x256xf32>
    %c0_66 = arith.constant 0 : index
    %c0_67 = arith.constant 0 : index
    %54 = vector.load %arg5[%c0_66, %c0_67] : memref<6x1xf32, #tpu.memory_space<vmem>>, vector<6x1xf32>
    %55 = vector.broadcast %54 : vector<6x1xf32> to vector<6x256xf32>
    %56 = arith.addf %53, %55 : vector<6x256xf32>
    %cst_68 = arith.constant 0.000000e+00 : f32
    %57 = vector.broadcast %cst_68 : f32 to vector<6x256xf32>
    %58 = arith.maximumf %56, %57 : vector<6x256xf32>
    %59 = arith.truncf %58 : vector<6x256xf32> to vector<6x256xbf16>
    %c0_69 = arith.constant 0 : index
    %c0_70 = arith.constant 0 : index
    %c0_71 = arith.constant 0 : index
    %60 = vector.load %arg6[%c0_69, %c0_70, %c0_71] : memref<1x6x256xbf16, #tpu.memory_space<vmem>>, vector<1x6x256xbf16>
    %61 = vector.shape_cast %60 : vector<1x6x256xbf16> to vector<6x256xbf16>
    %62 = vector.shape_cast %59 : vector<6x256xbf16> to vector<1x6x256xbf16>
    tpu.vector_store %arg6[%c0_69, %c0_70, %c0_71], %62 {strides = array<i32>} : memref<1x6x256xbf16, #tpu.memory_space<vmem>>, vector<1x6x256xbf16>,
    return
  }
  func.func @transform_0(%arg0: i32, %arg1: i32) -> (i32, i32, i32) {
    %c0_i32 = arith.constant 0 : i32
    %c0_i32_0 = arith.constant 0 : i32
    return %arg0, %c0_i32, %arg1 : i32, i32, i32
  }
  func.func @transform_1(%arg0: i32, %arg1: i32) -> (i32, i32, i32) {
    %c1_i32 = arith.constant 1 : i32
    %0 = arith.addi %arg1, %c1_i32 : i32
    %c1_i32_0 = arith.constant 1 : i32
    %1 = arith.muli %0, %c1_i32_0 : i32
    %c0_i32 = arith.constant 0 : i32
    %c0_i32_1 = arith.constant 0 : i32
    return %arg0, %c0_i32, %1 : i32, i32, i32
  }
  func.func @transform_2(%arg0: i32, %arg1: i32) -> (i32, i32) {
    %c0_i32 = arith.constant 0 : i32
    %c0_i32_0 = arith.constant 0 : i32
    %c0_i32_1 = arith.constant 0 : i32
    return %c0_i32, %c0_i32_0 : i32, i32
  }
  func.func @transform_3(%arg0: i32, %arg1: i32) -> (i32, i32) {
    %c0_i32 = arith.constant 0 : i32
    %c0_i32_0 = arith.constant 0 : i32
    %c0_i32_1 = arith.constant 0 : i32
    return %c0_i32, %c0_i32_0 : i32, i32
  }
  func.func @transform_4(%arg0: i32, %arg1: i32) -> (i32, i32, i32) {
    %c0_i32 = arith.constant 0 : i32
    %c0_i32_0 = arith.constant 0 : i32
    return %arg0, %c0_i32, %arg1 : i32, i32, i32
  }
}

</mosaic_0001>

<bundles_post_ra>
// kernel: tpu_custom_call.1
= control target key start
LH: loop header
LB: loop body
LE: loop exit
PB: predicated region body
PF: predicated region fallthrough
CT: control target
= control target key end

     0   :  { %9 = vsyncpa [#allocation4], 0  ;;  %s1270_s0 = inlined_call_operand.hbm [shape: bf16[2,4,512], index: 0, kind: input, shape index: {}]   ;;  %s1271_s1 = inlined_call_operand.hbm [shape: bf16[2,4,512], index: 1, kind: input, shape index: {}]   ;;  %s1272_s2 = inlined_call_operand.vmem [shape: bf16[6,36], index: 2, kind: input, shape index: {}]   ;;  %s1273_s3 = inlined_call_operand.vmem [shape: f32[6,1], index: 3, kind: input, shape index: {}]   ;;  %s1274_s4 = inlined_call_operand.vmem [shape: bf16[2,6,256], index: 4, kind: output, shape index: {}]  }
   0x1   :  { %11 = vsyncpa [#allocation4 + $0x1], 0 }
   0x2   :  { %12 = vsyncpa [#allocation6], 0 }
   0x3   :  { %14 = vsyncpa [#allocation6 + $0x1], 0  ;;  %s1069_s15 = smov 0   ;;  %s1071_s16 = smov 0  }
   0x4   :  { %s1073_s17 = smov 0   ;;  %s1075_s18 = smov 0  }
   0x5   :  { %s1077_s19 = smov 0   ;;  %s1079_s20 = smov 0  }
   0x6 LB: > { %s790_s21 = sadd.s32 4294967295, %s1030_s20   ;;  %s32_s22 = sadd.s32 1, %s1026_s19  ;;  %s1030_s20 = sphi %s1079_s20, %s20_s20   ;;  %s1026_s19 = sphi %s1077_s19, %s1288_s19   ;;  %s1022_s18 = sphi %s1075_s18, %s1287_s18   ;;  %s1018_s17 = sphi %s1073_s17, %s1286_s17   ;;  %s1014_s16 = sphi %s1071_s16, %s1285_s16   ;;  %s1010_s15 = sphi %s1069_s15, %s1284_s15  }
   0x7   : > { %p34_p0 = scmp.ge.s32.totalorder %s32_s22, 2  ;;  %s41_s23 = sadd.s32 1, %s1018_s17 }
   0x8   : > { %p48_p1 = scmp.ne.s32.totalorder %s1018_s17, %s1014_s16  ;;  %p49_p2 = scmp.eq.s32.totalorder %s1030_s20, 0 }
   0x9   : > { %s1290_s22 = smov (%p34_p0, %s32_s22), 0  ;;  %p54_p4 = scmp.ne.s32.totalorder %s1014_s16, %s1010_s15 }
   0xa   : > { %p1105_p3 = por %p49_p2, %p48_p1  ;;  %s36_s25 = ssub.s32 %s1026_s19, %s1290_s22 }
   0xb   : > { %p55_p5 = scmp.eq.s32.totalorder %s790_s21, 0  ;;  %p39_p6 = scmp.eq.s32.totalorder %s36_s25, 0 }
   0xc   : > { %p840_p8 = scmp.lt.s32.totalorder %s1030_s20, 2  ;;  %s1121_s28 = sand.u32 1, %s1018_s17  }
   0xd   : > { %p1112_p7 = por %p55_p5, %p54_p4  ;;  %s825_s29 = sshll.u32 %s1026_s19, 7 }
   0xe   : > { %s1118_s27 = scalar_select %p39_p6, %s1018_s17, %s41_s23  }
   0xf   : > { %s1277_s26 = scalar_select %p1112_p7, 1, 0 }
  0x10   : > { %s794_s30 = sshll.u32 %s1121_s28, 2  ;;  %s1130_s7 = scalar_lea.hbm %s1270_s0, %s825_s29 }
  0x11   : > { %s188_s8 = scalar_lea.vmem [#allocation3], %s794_s30  ;;  %p1136_p9 = pnand %p840_p8, %p1105_p3 }
  0x12   : > { %s198_s9 = sshll.u32 %s188_s8, 4  ;;  %s185_s11 = scalar_lea.sflag [#allocation4], %s1121_s28  ;;  %s1140_s9 = int_to_ptr.vmem [resolvable:$true] %s198_s9 }
  0x13   : > { %s915_s12 = scalar_lea.hbm %s1130_s7, 64  ;;  %p917_p13 = pneg %p1136_p9 }
  0x14   : > { %p916_p12 = scmp.ne.s32.totalorder %s1130_s7, %s915_s12  ;;  %s920_s15 = scalar_lea.hbm %s1270_s0, 256 }
  0x15   : > { %p921_p2 = scmp.lt.u32.totalorder %s1130_s7, %s1270_s0  ;;  %p922_p3 = scmp.lt.u32.totalorder %s920_s15, %s915_s12 }
  0x16   : > { %p918_p0 = pnand %p917_p13, %p916_p12  ;;  %p924_p5 = scmp.lt.u32.totalorder %s915_s12, %s1130_s7 }
  0x17   : > { %p923_p4 = por %p922_p3, %p921_p2 }
  0x18   : > { %p919_p1 = pneg %p918_p0 }
  0x19   : > { %p925_p6 = por %p924_p5, %p923_p4 }
  0x1b   : > { %p926_p8 = pnand %p925_p6, %p919_p1 }
  0x1d   : > { %929 = shalt.err (!%p926_p8)
}
  0x1e   : > { %s930_s24 = scalar_lea.vmem %s1140_s9, 64  ;;  %s1032_s25 = smov [#allocation3]  }
  0x1f   : > { %p931_p12 = scmp.ne.s32.totalorder %s1140_s9, %s930_s24  ;;  %s935_s5 = sshll.u32 %s1032_s25, 4  ;;  %s936_s5 = int_to_ptr.vmem [resolvable:$false] %s935_s5 }
  0x20   : > { %s937_s6 = scalar_lea.vmem %s936_s5, 128  ;;  %p938_p11 = scmp.lt.s32.totalorder %s1140_s9, %s936_s5 }
  0x21   : > { %p933_p0 = pnand %p931_p12, %p917_p13  ;;  %p939_p2 = scmp.lt.s32.totalorder %s937_s6, %s930_s24 }
  0x23   : > { %p934_p10 = pneg %p933_p0  ;;  %p940_p3 = por %p939_p2, %p938_p11 }
  0x25   : > { %p941_p4 = pnand %p940_p3, %p934_p10 }
  0x27   : > { %944 = shalt.err (!%p941_p4)
}
  0x28   : > { %836 = dma.hbm_to_vmem [thread:$0]  (!%p1136_p9), %s1130_s7, 64, %s1140_s9, %s185_s11  }
  0x29   : > { %p1279_p1 = scmp.lt.s32.totalorder %s1030_s20, 3  ;;  %p1280_p5 = scmp.ge.s32.totalorder %s1030_s20, 1 }
  0x2a   : > { %s719_s14 = scalar_lea.hbm %s1271_s1, %s825_s29  ;;  %s209_s21 = scalar_lea.vmem [#allocation5], %s794_s30 }
  0x2b   : > { %p1174_p6 = pnand %p1280_p5, %p1279_p1  ;;  %s1183_s15 = scalar_lea.hbm %s719_s14, 64 }
  0x2c   : > { %s220_s23 = sshll.u32 %s209_s21, 4  ;;  %s206_s7 = scalar_lea.sflag [#allocation6], %s1121_s28  ;;  %s221_s23 = int_to_ptr.vmem [resolvable:$true] %s220_s23 }
  0x2d   : > { %s1281_s8 = scalar_select %p1174_p6, 1, 0 }
  0x2e   : > { %s975_s9 = scalar_lea.hbm %s719_s14, 128  ;;  %s950_s29 = scalar_lea.hbm %s1271_s1, 256 }
  0x2f   : > { %p946_p10 = scmp.ne.s32.totalorder %s1183_s15, %s975_s9  ;;  %p951_p12 = scmp.lt.u32.totalorder %s1183_s15, %s1271_s1 }
  0x30   : > { %p952_p0 = scmp.lt.u32.totalorder %s950_s29, %s975_s9  ;;  %p954_p3 = scmp.lt.u32.totalorder %s975_s9, %s1183_s15 }
  0x31   : > { %p948_p11 = pnand %p946_p10, %p917_p13 }
  0x32   : > { %p953_p2 = por %p952_p0, %p951_p12 }
  0x33   : > { %p949_p8 = pneg %p948_p11 }
  0x34   : > { %p955_p4 = por %p954_p3, %p953_p2 }
  0x36   : > { %p956_p1 = pnand %p955_p4, %p949_p8 }
  0x38   : > { %959 = shalt.err (!%p956_p1)
}
  0x39   : > { %s960_s28 = scalar_lea.vmem %s221_s23, 64  ;;  %s1033_s30 = smov [#allocation5]  }
  0x3a   : > { %p961_p5 = scmp.ne.s32.totalorder %s221_s23, %s960_s28  ;;  %s965_s6 = sshll.u32 %s1033_s30, 4  ;;  %s966_s6 = int_to_ptr.vmem [resolvable:$false] %s965_s6 }
  0x3b   : > { %s967_s12 = scalar_lea.vmem %s966_s6, 128  ;;  %p968_p7 = scmp.lt.s32.totalorder %s221_s23, %s966_s6 }
  0x3c   : > { %p963_p10 = pnand %p961_p5, %p917_p13  ;;  %p969_p6 = scmp.lt.s32.totalorder %s967_s12, %s960_s28 }
  0x3e   : > { %p964_p11 = pneg %p963_p10  ;;  %p970_p0 = por %p969_p6, %p968_p7 }
  0x40   : > { %p971_p12 = pnand %p970_p0, %p964_p11 }
  0x42   : > { %974 = shalt.err (!%p971_p12)
}
  0x43   : > { %839 = dma.hbm_to_vmem [thread:$0]  (!%p1136_p9), %s1183_s15, 64, %s221_s23, %s206_s7  }
  0x44   : > { %p1282_p8 = scmp.ne.s32.totalorder %s1281_s8, 0 }
  0x45   : > { %s231_s13 = sand.u32 (!%p1282_p8), 1, %s1014_s16   ;;  %p1283_p13 = scmp.ne.s32.totalorder (!%p1282_p8), %s1277_s26, 0 }
  0x46   : > { %229 = sbr.rel (%p1282_p8) target bundleno = 466 (0x1d2), region = 36  ;;  %s801_s14 = sshll.u32 (!%p1282_p8), %s231_s13, 2 }
  0x47   : > { %s232_s21 = scalar_lea.sflag (!%p1282_p8), [#allocation4], %s231_s13  ;;  %s1209_s9 = scalar_lea.vmem (!%p1282_p8), [#allocation3], %s801_s14 }
  0x4d   : > { %1001 = dma.done.wait (%p1283_p13), %s232_s21, 64  }
  0x4e   : > { %1003 = vsyncadd (%p1283_p13), %s232_s21, 4294967232  ;;  %s241_s11 = scalar_lea.sflag [#allocation6], %s231_s13  ;;  %s1215_s10 = scalar_lea.vmem [#allocation5], %s801_s14 }
  0x4f   : > { %1005 = dma.done.wait (%p1283_p13), %s241_s11, 64  }
  0x50   : > { %1007 = vsyncadd (%p1283_p13), %s241_s11, 4294967232  ;;  %v309_v0 = vlaneseq  ;;  %v1034_v1 = vmov 1983009808   ;;  %s1035_s8 = smov 126   ;;  %v900_v7 = vld [vmem:[%s1209_s9] ss:$0 sps:$4 sm:$0xff]  }
  0x51   : > { %v307_v2 = vunpack.c.l.s4 %v1034_v1  ;;  %v806_v6 = vld.sshfl [vmem:[%s1209_s9] sm:$0x33 pattern:$0x76325410]  ;;  %s1036_s26 = smov 112   ;;  %s1037_s15 = smov 111  }
  0x52   : > { %v310_v3 = vshrl.u32 %v309_v0, 7  ;;  %347 = vrot.lane.b32.xlu0 %v806_v6, %s1035_s8  ;;  %v807_v8 = vld.sshfl [vmem:[%s1215_s10] sm:$0x3 pattern:$0x76325410]  ;;  %s1038_s23 = smov 127  }
  0x53   : > { %v308_v4 = vunpack.c.0.s8 %v307_v2  ;;  %302 = vst [vmem:[#allocation2] sm:$0x33] %v806_v6  ;;  %v901_v9 = vld [vmem:[%s1215_s10] ss:$0 sps:$4 sm:$0x33]   ;;  %s1039_s7 = smov 110  }
  0x54   : > { %v902_v11 = vld [vmem:[%s1215_s10] ss:$0 sps:$4 sm:$0x33]   ;;  %v903_v13 = vld [vmem:[%s1209_s9] ss:$0 sps:$4 sm:$0xff]   ;;  %s1040_s24 = smov 96  }
  0x55   : > { %v311_v5 = vsub.s32 %v308_v4, %v310_v3  ;;  %v904_v16 = vld [vmem:[%s1209_s9] ss:$0 sps:$4 sm:$0xff]   ;;  %v906_v20 = vld [vmem:[%s1215_s10] ss:$0 sps:$4 sm:$0x33]   ;;  %s1041_s29 = smov 95  }
  0x56   : > { %366 = vrot.lane.b32.xlu0 %v807_v8, %s1035_s8  ;;  %v905_v18 = vld [vmem:[%s1209_s9] ss:$0 sps:$4 sm:$0xff]   ;;  %v907_v22 = vld [vmem:[%s1215_s10] ss:$0 sps:$4 sm:$0x33]   ;;  %s1042_s25 = smov 94  }
  0x57   : > { %v380_v10 = vrot.slane %v900_v7, %v311_v5  ;;  %v332_v12 = vrot.slane %v901_v9, %v311_v5  ;;  %v399_v14 = vrot.slane %v902_v11, %v311_v5  ;;  %v312_v15 = vrot.slane %v903_v13, %v311_v5  ;;  %v575_v25 = vld [vmem:[%s1273_s3] sm:$0x3f]  ;;  %p282_p7 = scmp.lt.s32.totalorder %s1022_s18, 1 }
  0x58   : > { %v446_v17 = vrot.slane %v904_v16, %v311_v5  ;;  %v512_v19 = vrot.slane %v905_v18, %v311_v5  ;;  %v465_v21 = vrot.slane %v906_v20, %v311_v5  ;;  %v531_v23 = vrot.slane %v907_v22, %v311_v5  ;;  %v569_v4 = vld [vmem:[%s1272_s2] sm:$0x7] }
  0x59   : > { %381 = vrot.lane.b32.xlu1 %v380_v10, %s1036_s26  ;;  %v1043_v24 = vmov 0   ;;  %vm353_vm0 = vcmask 1041408   ;;  %vm354_vm1 = vcmask 1029124   ;;  %vm350_vm2 = vcmask 1031168   ;;  %s1292_s18 = smov (!%p282_p7, %s1022_s18), 1 }
  0x5a   : > { %414 = vrot.lane.b32.xlu0 %v806_v6, %s1037_s15  ;;  %648 = vmatprep.mubr.bf16.mxu0 %v1043_v24  ;;  %vm355_vm3 = vmor %vm354_vm1, %vm353_vm0  ;;  %vm319_vm4 = vcmask 1043458   ;;  %vm387_vm5 = vcmask 916486   ;;  %vm369_vm6 = vcmask 1042416   ;;  %vm384_vm7 = vcmask 916480   ;;  %s827_s12 = sshll.u32 %s1292_s18, 3 }
  0x5b   : > { %899 = vset.pattern.permute.xlu0 %v1043_v24  ;;  %vm388_vm8 = vmor %vm387_vm5, %vm319_vm4  ;;  %vm420_vm9 = vcmask 906244   ;;  %vm417_vm10 = vcmask 908288   ;;  %vm403_vm12 = vcmask 1044354   ;;  %vm320_vm13 = vcmask 1039366   ;;  %s289_s21 = scalar_lea.vmem %s1274_s4, %s827_s12 }
  0x5c   : > { %vm421_vm11 = vmor %vm420_vm9, %vm353_vm0  ;;  %vm316_vm14 = vcmask 1039360   ;;  %vm453_vm1 = vcmask 900102   ;;  %vm450_vm5 = vcmask 900096   ;;  %vm519_vm9 = vcmask 777222  }
  0x5d   : > { %333 = vrot.lane.b32.xlu1 %v332_v12, %s1038_s23  ;;  %vm321_vm15 = vmor %vm320_vm13, %vm319_vm4  ;;  %vm469_vm13 = vcmask 1044338  }
  0x5e   : > { %313 = vrot.lane.b32.xlu0 %v312_v15, %s1038_s23 }
  0x61   : > { %400 = vrot.lane.b32.xlu1 %v399_v14, %s1036_s26 }
  0x62   : > { %480 = vrot.lane.b32.xlu0 %v806_v6, %s1040_s24 }
  0x65   : > { %447 = vrot.lane.b32.xlu1 %v446_v17, %s1039_s7 }
  0x66   : > { %432 = vrot.lane.b32.xlu0 %v807_v8, %s1037_s15 }
  0x69   : > { %513 = vrot.lane.b32.xlu1 %v512_v19, %s1041_s29 }
  0x6a   : > { %498 = vrot.lane.b32.xlu0 %v807_v8, %s1040_s24 }
  0x6d   : > { %466 = vrot.lane.b32.xlu1 %v465_v21, %s1039_s7 }
  0x6e   : > { %546 = vrot.lane.b32.xlu0 %v806_v6, %s1042_s25 }
  0x71   : > { %532 = vrot.lane.b32.xlu1 %v531_v23, %s1041_s29 }
  0x72   : > { %578 = vperm.xlu0 %899, %v575_v25  }
  0x75   : > { %564 = vrot.lane.b32.xlu1 %v807_v8, %s1042_s25 }
  0xc4   : > { %v348_v26 = vpop.permute.xlu0 %347 }
  0xc5   : > { %v349_v27 = vrot.slane %v348_v26, 4 }
  0xc7   : > { %v351_v28 = vsel %vm350_vm2, %v348_v26, %v349_v27  ;;  %vm336_vm2 = vcmask 1044474  }
  0xc8   : > { %356 = vst.msk [vmem:[#allocation2 + $0x8] sm:$0x33] %vm355_vm3, %v351_v28  ;;  %v367_v30 = vpop.permute.xlu0 %366  ;;  %vm486_vm3 = vcmask 783364  }
  0xc9   : > { %370 = vst.msk [vmem:[#allocation2 + $0xc] sm:$0x3] %vm369_vm6, %v367_v30  ;;  %vm454_vm6 = vmor %vm453_vm1, %vm319_vm4  ;;  %vm552_vm1 = vcmask 766980  }
  0xcb   : > { %v382_v29 = vpop.permute.xlu1 %381 }
  0xcc   : > { %v383_v31 = vrot.slane %v382_v29, 4  ;;  %v415_v33 = vpop.permute.xlu0 %414 }
  0xcd   : > { %v416_v35 = vrot.slane %v415_v33, 4 }
  0xce   : > { %v385_v32 = vsel %vm384_vm7, %v382_v29, %v383_v31  ;;  %vm483_vm7 = vcmask 785408  }
  0xcf   : > { %389 = vst.msk [vmem:[#allocation2 + $0x8] sm:$0xcc] %vm388_vm8, %v385_v32  ;;  %v334_v34 = vpop.permute.xlu1 %333  ;;  %v418_v36 = vsel %vm417_vm10, %v415_v33, %v416_v35  ;;  %vm487_vm8 = vmor %vm486_vm3, %vm353_vm0  ;;  %vm435_vm10 = vcmask 1042296   ;;  %vm567_vm3 = vcmask 1042160  }
  0xd0   : > { %422 = vst.msk [vmem:[#allocation2 + $0x10] sm:$0x33] %vm421_vm11, %v418_v36  ;;  %v314_v38 = vpop.permute.xlu0 %313  ;;  %vm516_vm11 = vcmask 777216  }
  0xd1   : > { %v315_v39 = vrot.slane %v314_v38, 4 }
  0xd3   : > { %v401_v37 = vpop.permute.xlu1 %400  ;;  %v317_v40 = vsel %vm316_vm14, %v314_v38, %v315_v39  ;;  %vm501_vm14 = vcmask 1042176  }
  0xd4   : > { %404 = vst.msk [vmem:[#allocation2 + $0xc] sm:$0xc] %vm403_vm12, %v401_v37  ;;  %v481_v42 = vpop.permute.xlu0 %480  ;;  %vm520_vm12 = vmor %vm519_vm9, %vm319_vm4  ;;  %vm549_vm4 = vcmask 769024  }
  0xd5   : > { %322 = vst.msk [vmem:[#allocation2] sm:$0xcc] %vm321_vm15, %v317_v40  ;;  %v482_v44 = vrot.slane %v481_v42, 4  ;;  %vm535_vm15 = vcmask 1044218  }
  0xd6   : > { %337 = vst.msk [vmem:[#allocation2 + $0x4] sm:$0xc] %vm336_vm2, %v334_v34  ;;  %vm553_vm2 = vmor %vm552_vm1, %vm353_vm0 }
  0xd7   : > { %v448_v41 = vpop.permute.xlu1 %447  ;;  %v484_v46 = vsel %vm483_vm7, %v481_v42, %v482_v44 }
  0xd8   : > { %v449_v43 = vrot.slane %v448_v41, 4  ;;  %488 = vst.msk [vmem:[#allocation2 + $0x18] sm:$0x33] %vm487_vm8, %v484_v46  ;;  %v433_v48 = vpop.permute.xlu0 %432 }
  0xd9   : > { %436 = vst.msk [vmem:[#allocation2 + $0x14] sm:$0x3] %vm435_vm10, %v433_v48 }
  0xda   : > { %v451_v45 = vsel %vm450_vm5, %v448_v41, %v449_v43  ;;  %vm606_vm5 = vcmask 293888  }
  0xdb   : > { %455 = vst.msk [vmem:[#allocation2 + $0x10] sm:$0xcc] %vm454_vm6, %v451_v45  ;;  %v514_v47 = vpop.permute.xlu1 %513  ;;  %v571_v54 = vld [vmem:[#allocation2 + $0x8] sm:$0xff] }
  0xdc   : > { %v515_v49 = vrot.slane %v514_v47, 4  ;;  %v499_v52 = vpop.permute.xlu0 %498 }
  0xdd   : > { %v570_v53 = vld [vmem:[#allocation2] sm:$0xff]  ;;  %502 = vst.msk [vmem:[#allocation2 + $0x1c] sm:$0x3] %vm501_vm14, %v499_v52 }
  0xde   : > { %v517_v50 = vsel %vm516_vm11, %v514_v47, %v515_v49  ;;  %v908_v55 = vld [vmem:[#allocation2 + $0x4] ss:$8 sps:$4 sm:$0xff]   ;;  %v814_v56 = vcombine.low %v570_v53, %v571_v54 }
  0xdf   : > { %521 = vst.msk [vmem:[#allocation2 + $0x18] sm:$0xcc] %vm520_vm12, %v517_v50  ;;  %v467_v51 = vpop.permute.xlu1 %466  ;;  %616 = vmatprep.subr.bf16.mxu0 %v908_v55 }
  0xe0   : > { %470 = vst.msk [vmem:[#allocation2 + $0x14] sm:$0xc] %vm469_vm13, %v467_v51  ;;  %617 = vmatpush1.bf16.msra.mxu0 %v814_v56  ;;  %v547_v58 = vpop.permute.xlu0 %546 }
  0xe1   : > { %v548_v59 = vrot.slane %v547_v58, 4 }
  0xe3   : > { %v533_v57 = vpop.permute.xlu1 %532  ;;  %v550_v60 = vsel %vm549_vm4, %v547_v58, %v548_v59 }
  0xe4   : > { %536 = vst.msk [vmem:[#allocation2 + $0x1c] sm:$0xc] %vm535_vm15, %v533_v57 }
  0xe5   : > { %554 = vst.msk [vmem:[#allocation2 + $0x20] sm:$0x33] %vm553_vm2, %v550_v60 }
  0xe6   : > { %v912_v63 = vld [vmem:[#allocation2 + $0x10] ss:$8 sps:$4 sm:$0xff]  }
  0xe7   : > { %v565_v61 = vpop.permute.xlu1 %564 }
  0xe8   : > { %568 = vst.msk [vmem:[#allocation2 + $0x24] sm:$0x3] %vm567_vm3, %v565_v61 }
  0xeb   : > { %v910_v62 = vld [vmem:[#allocation2 + $0x14] ss:$8 sps:$4 sm:$0xff]  }
  0xec   : > { %618 = vmatprep.subr.bf16.mxu0 %v910_v62 }
  0xed   : > { %619 = vmatpush1.bf16.msra.mxu0 %v912_v63 }
  0xef   : > { %v574_v0 = vld [vmem:[#allocation2 + $0x20] sm:$0x33] }
  0xf0   : > { %v819_v1 = vcombine.high %v574_v0, %v574_v0  ;;  %v818_v2 = vcombine.low %v574_v0, %v574_v0 }
  0xf1   : > { %v579_v5 = vpop.permute.xlu0 %578 }
  0xf2   : > { %820 = vmatprep.subr.msk.bf16.mxu0 %vm353_vm0, %v819_v1  ;;  %v611_v3 = vsel %vm353_vm0, %v818_v2, 0 }
  0xf3   : > { %621 = vmatpush1.bf16.msra.mxu0 %v611_v3 }
  0xf6   : > { %821 = vmatmul.mubr.msk.bf16.vlgmr.msra.gmra.mrb[0].mxu0 %vm606_vm5, %v569_v4 }
 0x1c9   : > { %v650_v6 = vpop.f32.mrb[0].mxu0 }
 0x1ca   : > { %v651_v7 = vadd.f32 %v650_v6, %v579_v5  ;;  %v652_v8 = vpop.f32.mrb[1].mxu0 }
 0x1cb   : > { %v653_v9 = vadd.f32 %v652_v8, %v579_v5  ;;  %v654_v10 = vpop.f32.mrb[2].mxu0 }
 0x1cc   : > { %v657_v11 = vmax.f32 %v651_v7, 0.0  ;;  %v655_v12 = vpop.f32.mrb[3].mxu0 }
 0x1cd   : > { %v658_v13 = vmax.f32 %v653_v9, 0.0 }
 0x1cf   : > { %v828_v14 = vpack.c.bf16 %v658_v13, %v657_v11 }
 0x1d1   : > { %667 = vst [vmem:[%s289_s21] sm:$0x77] %v828_v14 }
 0x1d2 PF: > { %s20_s20 = sadd.s32 1, %s1030_s20   ;;  %s1284_s15 = smov %s1014_s16 }
 0x1d3   : > { %p17_p9 = scmp.ge.s32.totalorder %s20_s20, 4   ;;  %s1285_s16 = smov %s1018_s17 }
 0x1d4   : > { %s1286_s17 = smov %s1118_s27  ;;  %s1287_s18 = smov %s1026_s19 }
 0x1d5   : > { %s1288_s19 = smov %s1290_s22  ;;  %19 = sbr.rel (!%p17_p9) target bundleno = 6 (0x6), region = 89 }
 0x1dc   :  { %698 = vsyncpa [#allocation4], 1 }
 0x1dd   :  { %700 = vsyncpa [#allocation4 + $0x1], 1 }
 0x1de   :  { %701 = vsyncpa [#allocation6], 1 }
 0x1df   :  { %703 = vsyncpa [#allocation6 + $0x1], 1 }

</bundles_post_ra>
